<compile_context>
chip_gen: v6e
topology: v6e:2x2x1
jax: 0.10.0
libtpu: 0.0.40
codegen_flags: <defaults>
</compile_context>

<pallas_src>
import functools

import jax
import jax.numpy as jnp
from jax.experimental import pallas as pl
from jax.experimental.pallas import tpu as pltpu


_LANE = 128
_SUBLANE = 8


def _round_up(x, m):
    return ((x + m - 1) // m) * m


# ----------------------------- kernel --------------------------------------- #

def _make_fused_mlp_kernel(n_layers, out_features):
    """Build a fused kernel for `n_layers` linear layers (last one -> log_softmax).

    Kernel signature: (x_ref, w0, b0, w1, b1, ..., o_ref).
    Activations chain in-register / in-VMEM; nothing touches HBM between layers.
    """

    def kernel(*refs):
        x_ref = refs[0]
        o_ref = refs[-1]
        wb = refs[1:-1]

        # In-kernel bf16 cast (x streams in as unpadded f32; no wrapper pad/cast).
        h = x_ref[...].astype(jnp.bfloat16)          # (tile_b, in_features)
        for i in range(n_layers):
            w = wb[2 * i][...]                       # bf16 (d_in[_p], d_out_p)
            b = wb[2 * i + 1][...]                   # f32  (1, d_out_p)
            # MXU: bf16 inputs, f32 accumulation.
            y = jnp.dot(h, w, preferred_element_type=jnp.float32) + b
            if i < n_layers - 1:
                # f32 epilogue (ReLU), recast to bf16 only for the next matmul.
                h = jnp.maximum(y, 0.0).astype(jnp.bfloat16)
            else:
                # Masked, numerically-stable log_softmax over the real classes.
                # (-1e30 mask is safe because this path stays in float32.)
                cols = jax.lax.broadcasted_iota(jnp.int32, y.shape, 1)
                logits = jnp.where(cols < out_features, y, -1e30)
                m = jnp.max(logits, axis=-1, keepdims=True)
                z = logits - m
                lse = jnp.log(jnp.sum(jnp.exp(z), axis=-1, keepdims=True))
                o_ref[...] = (z - lse).astype(o_ref.dtype)

    return kernel


def _fused_mlp_call(x_p, packed_params, out_features, tile_b):
    """Single pallas_call running the whole fused MLP."""
    batch_p, in_features = x_p.shape
    out_p = packed_params[-1][1].shape[1]
    n_layers = len(packed_params)
    grid_len = batch_p // tile_b

    # Deeper pipelining of the only streaming operand when the grid is deep
    # (thin layers -> short per-step compute -> exposed input DMA otherwise).
    x_bufs = 3 if grid_len >= 3 else 2
    in_specs = [pl.BlockSpec((tile_b, in_features), lambda i: (i, 0),
                             pipeline_mode=pl.Buffered(x_bufs))]
    flat_args = [x_p]
    for w_p, b_p in packed_params:
        # Constant index_map + Buffered(1): fetched once, single VMEM buffer.
        in_specs.append(pl.BlockSpec(w_p.shape, lambda i: (0, 0),
                                     pipeline_mode=pl.Buffered(1)))
        in_specs.append(pl.BlockSpec(b_p.shape, lambda i: (0, 0),
                                     pipeline_mode=pl.Buffered(1)))
        flat_args.append(w_p)
        flat_args.append(b_p)

    out_specs = pl.BlockSpec((tile_b, out_p), lambda i: (i, 0))

    # ---- explicit VMEM budget (operand buffers + f32 intermediates) ---------
    w_bytes = sum(int(w.size) * 2 + int(b.size) * 4 for w, b in packed_params)
    x_bytes = x_bufs * tile_b * in_features * 4
    out_bytes = 2 * tile_b * out_p * 4
    widest = max([in_features] + [w.shape[1] for w, _ in packed_params])
    interm_bytes = 4 * tile_b * widest * 4            # f32 temporaries headroom
    need = w_bytes + x_bytes + out_bytes + interm_bytes
    vmem_limit = int(min(64 << 20, max(32 << 20, (need * 3) // 2)))

    # ---- cost estimate for the XLA scheduler --------------------------------
    flops = 2 * batch_p * sum(int(w.shape[0]) * int(w.shape[1])
                              for w, _ in packed_params)
    transcendentals = batch_p * out_p                 # exp + log in the epilogue
    bytes_accessed = (batch_p * in_features * 4 + w_bytes + batch_p * out_p * 4)

    return pl.pallas_call(
        _make_fused_mlp_kernel(n_layers, out_features),
        out_shape=jax.ShapeDtypeStruct((batch_p, out_p), jnp.float32),
        grid=(grid_len,),
        in_specs=in_specs,
        out_specs=out_specs,
        compiler_params=pltpu.CompilerParams(
            dimension_semantics=("parallel",),
            vmem_limit_bytes=vmem_limit),
        cost_estimate=pl.CostEstimate(
            flops=flops,
            transcendentals=transcendentals,
            bytes_accessed=bytes_accessed),
    )(*flat_args)


# ----------------------------- params --------------------------------------- #

def init_classifier_params(key, in_features, out_features, hidden_layers):
    """Deterministic parameter init mirroring nn.Linear shapes.

    Weights are stored transposed as (fan_in, fan_out) for the kernel.
    """
    params = []
    sizes = [in_features] + list(hidden_layers) + [out_features]
    for fan_in, fan_out in zip(sizes[:-1], sizes[1:]):
        key, kw, kb = jax.random.split(key, 3)
        bound = 1.0 / jnp.sqrt(jnp.float32(fan_in))
        w = jax.random.uniform(kw, (fan_in, fan_out), jnp.float32, -bound, bound)
        b = jax.random.uniform(kb, (1, fan_out), jnp.float32, -bound, bound)
        params.append((w, b))
    return params


def pack_params(params):
    """Pad feature dims to 128 multiples and cast weights to bf16.

    The FIRST layer keeps its unpadded fan_in so the activation x can stream
    into the kernel unpadded (no wrapper-side pad/cast pass).  All other padded
    rows/columns are zero, so padded hidden activations are relu(0) = 0 and
    never affect real outputs.  Biases stay float32 for the f32 epilogue.
    """
    packed = []
    for idx, (w, b) in enumerate(params):
        fan_in, fan_out = w.shape
        in_p = fan_in if idx == 0 else _round_up(fan_in, _LANE)
        out_p = _round_up(fan_out, _LANE)
        w_p = jnp.zeros((in_p, out_p), jnp.bfloat16)
        w_p = w_p.at[:fan_in, :fan_out].set(w.astype(jnp.bfloat16))
        b_p = jnp.zeros((1, out_p), jnp.float32)
        b_p = b_p.at[:, :fan_out].set(b)
        packed.append((w_p, b_p))
    return packed


# ----------------------------- forward -------------------------------------- #

def _choose_tile_b(batch):
    """Batch tile: >=2 grid steps when possible (v7x megacore), 256-row cap."""
    batch8 = _round_up(batch, _SUBLANE)
    if batch8 <= 16:
        return batch8
    return min(256, _round_up(-(-batch8 // 2), _SUBLANE))


@functools.partial(jax.jit, static_argnames=("out_features",))
def classifier_forward(x, packed_params, out_features):
    """Forward pass: fused hidden Linear+ReLU layers + final Linear + log_softmax."""
    batch, in_features = x.shape

    tile_b = _choose_tile_b(batch)
    batch_p = _round_up(batch, tile_b)          # pad only to the tile size

    if batch_p != batch:
        x_in = jnp.zeros((batch_p, in_features), x.dtype).at[:batch].set(x)
    else:
        x_in = x                                 # no wrapper-side copy at all

    out_p = _fused_mlp_call(x_in, packed_params, out_features, tile_b)
    # TODO(synk): fuse the downstream consumer (argmax / NLL) into the kernel
    # epilogue to avoid this slice entirely when out_features << 128.
    return out_p[:batch, :out_features]


def _reference_forward(x, params):
    """Pure-JAX reference using the same bf16-matmul / f32-epilogue math."""
    *hidden, (w_out, b_out) = params
    h = x.astype(jnp.bfloat16)
    for w, b in hidden:
        y = jnp.dot(h, w.astype(jnp.bfloat16),
                    preferred_element_type=jnp.float32) + b
        h = jnp.maximum(y, 0.0).astype(jnp.bfloat16)
    logits = jnp.dot(h, w_out.astype(jnp.bfloat16),
                     preferred_element_type=jnp.float32) + b_out
    return jax.nn.log_softmax(logits, axis=1)


# ----------------------------- main ------------------------------------------ #

if __name__ == "__main__":
    key = jax.random.PRNGKey(0)
    key_x, key_p = jax.random.split(key)

    batch = 8
    in_features = 32
    hidden_layers = [64, 32]
    out_features = 10

    x = jax.random.normal(key_x, (batch, in_features), jnp.float32)
    raw_params = init_classifier_params(key_p, in_features, out_features,
                                        hidden_layers)
    packed_params = pack_params(raw_params)

    out = classifier_forward(x, packed_params, out_features)
    jax.block_until_ready(out)

    assert out.shape == (batch, out_features)

    # sanity: log_softmax rows should (exp-)sum to 1
    row_sums = jnp.sum(jnp.exp(out), axis=1)
    assert bool(jnp.allclose(row_sums, 1.0, atol=1e-4))

    # correctness vs pure-JAX reference using the same precision recipe
    ref = _reference_forward(x, raw_params)
    assert bool(jnp.allclose(out, ref, atol=2e-3, rtol=2e-3))

    print("KERNEL_OK")
</pallas_src>

<mosaic_0001>
module attributes {stable_mosaic.version = 11 : i64} {
  func.func @kernel(%arg0: i32, %arg1: memref<8x32xf32, #tpu.memory_space<vmem>>, %arg2: memref<32x128xbf16, #tpu.memory_space<vmem>>, %arg3: memref<1x128xf32, #tpu.memory_space<vmem>>, %arg4: memref<128x128xbf16, #tpu.memory_space<vmem>>, %arg5: memref<1x128xf32, #tpu.memory_space<vmem>>, %arg6: memref<128x128xbf16, #tpu.memory_space<vmem>>, %arg7: memref<1x128xf32, #tpu.memory_space<vmem>>, %arg8: memref<8x128xf32, #tpu.memory_space<vmem>>) attributes {dimension_semantics = [#tpu.dimension_semantics<parallel>], iteration_bounds = array<i64: 1>, scalar_prefetch = 0 : i64, scratch_operands = 0 : i64, tpu.core_type = #tpu.core_type<tc>, window_params = [{pipeline_mode = #tpu.pipeline_mode<double_buffered>, transform_indices = @transform_0, window_bounds = array<i64: 8, 32>}, {pipeline_mode = #tpu.pipeline_mode<synchronous>, transform_indices = @transform_1, window_bounds = array<i64: 32, 128>}, {pipeline_mode = #tpu.pipeline_mode<synchronous>, transform_indices = @transform_2, window_bounds = array<i64: 1, 128>}, {pipeline_mode = #tpu.pipeline_mode<synchronous>, transform_indices = @transform_3, window_bounds = array<i64: 128, 128>}, {pipeline_mode = #tpu.pipeline_mode<synchronous>, transform_indices = @transform_4, window_bounds = array<i64: 1, 128>}, {pipeline_mode = #tpu.pipeline_mode<synchronous>, transform_indices = @transform_5, window_bounds = array<i64: 128, 128>}, {pipeline_mode = #tpu.pipeline_mode<synchronous>, transform_indices = @transform_6, window_bounds = array<i64: 1, 128>}, {transform_indices = @transform_7, window_bounds = array<i64: 8, 128>}]} {
    %c0 = arith.constant 0 : index
    %c0_0 = arith.constant 0 : index
    %0 = vector.load %arg1[%c0, %c0_0] : memref<8x32xf32, #tpu.memory_space<vmem>>, vector<8x32xf32>
    %1 = arith.truncf %0 : vector<8x32xf32> to vector<8x32xbf16>
    %c0_1 = arith.constant 0 : index
    %c0_2 = arith.constant 0 : index
    %2 = vector.load %arg2[%c0_1, %c0_2] : memref<32x128xbf16, #tpu.memory_space<vmem>>, vector<32x128xbf16>
    %c0_3 = arith.constant 0 : index
    %c0_4 = arith.constant 0 : index
    %3 = vector.load %arg3[%c0_3, %c0_4] : memref<1x128xf32, #tpu.memory_space<vmem>>, vector<1x128xf32>
    %cst = arith.constant dense<0.000000e+00> : vector<8x128xf32>
    %4 = tpu.matmul %1, %2, %cst {dimension_numbers = #tpu.dot_dimension_numbers<[1], [0], [0], [1], [0, 0, 1, 1], [], []>} : vector<8x32xbf16>, vector<32x128xbf16>, vector<8x128xf32> -> vector<8x128xf32>
    %5 = vector.broadcast %3 : vector<1x128xf32> to vector<8x128xf32>
    %6 = arith.addf %4, %5 : vector<8x128xf32>
    %cst_5 = arith.constant 0.000000e+00 : f32
    %7 = vector.broadcast %cst_5 : f32 to vector<8x128xf32>
    %8 = arith.maximumf %6, %7 : vector<8x128xf32>
    %9 = arith.truncf %8 : vector<8x128xf32> to vector<8x128xbf16>
    %c0_6 = arith.constant 0 : index
    %c0_7 = arith.constant 0 : index
    %10 = vector.load %arg4[%c0_6, %c0_7] : memref<128x128xbf16, #tpu.memory_space<vmem>>, vector<128x128xbf16>
    %c0_8 = arith.constant 0 : index
    %c0_9 = arith.constant 0 : index
    %11 = vector.load %arg5[%c0_8, %c0_9] : memref<1x128xf32, #tpu.memory_space<vmem>>, vector<1x128xf32>
    %cst_10 = arith.constant dense<0.000000e+00> : vector<8x128xf32>
    %12 = tpu.matmul %9, %10, %cst_10 {dimension_numbers = #tpu.dot_dimension_numbers<[1], [0], [0], [1], [0, 0, 1, 1], [], []>} : vector<8x128xbf16>, vector<128x128xbf16>, vector<8x128xf32> -> vector<8x128xf32>
    %13 = vector.broadcast %11 : vector<1x128xf32> to vector<8x128xf32>
    %14 = arith.addf %12, %13 : vector<8x128xf32>
    %cst_11 = arith.constant 0.000000e+00 : f32
    %15 = vector.broadcast %cst_11 : f32 to vector<8x128xf32>
    %16 = arith.maximumf %14, %15 : vector<8x128xf32>
    %17 = arith.truncf %16 : vector<8x128xf32> to vector<8x128xbf16>
    %c0_12 = arith.constant 0 : index
    %c0_13 = arith.constant 0 : index
    %18 = vector.load %arg6[%c0_12, %c0_13] : memref<128x128xbf16, #tpu.memory_space<vmem>>, vector<128x128xbf16>
    %c0_14 = arith.constant 0 : index
    %c0_15 = arith.constant 0 : index
    %19 = vector.load %arg7[%c0_14, %c0_15] : memref<1x128xf32, #tpu.memory_space<vmem>>, vector<1x128xf32>
    %cst_16 = arith.constant dense<0.000000e+00> : vector<8x128xf32>
    %20 = tpu.matmul %17, %18, %cst_16 {dimension_numbers = #tpu.dot_dimension_numbers<[1], [0], [0], [1], [0, 0, 1, 1], [], []>} : vector<8x128xbf16>, vector<128x128xbf16>, vector<8x128xf32> -> vector<8x128xf32>
    %21 = vector.broadcast %19 : vector<1x128xf32> to vector<8x128xf32>
    %22 = arith.addf %20, %21 : vector<8x128xf32>
    %23 = tpu.iota {dimensions = array<i32: 1>} : vector<8x128xi32>
    %c10_i32 = arith.constant 10 : i32
    %24 = vector.broadcast %c10_i32 : i32 to vector<8x128xi32>
    %25 = arith.cmpi slt, %23, %24 : vector<8x128xi32>
    %cst_17 = arith.constant -1.000000e+30 : f32
    %26 = vector.broadcast %cst_17 : f32 to vector<8x128xf32>
    %27 = arith.select %25, %22, %26 : vector<8x128xi1>, vector<8x128xf32>
    %cst_18 = arith.constant dense<0xFF800000> : vector<8xf32>
    %28 = vector.multi_reduction <maximumf>, %27, %cst_18 [1] : vector<8x128xf32> to vector<8xf32>
    %29 = vector.shape_cast %28 : vector<8xf32> to vector<8x1xf32>
    %30 = vector.broadcast %29 : vector<8x1xf32> to vector<8x128xf32>
    %31 = arith.subf %27, %30 : vector<8x128xf32>
    %32 = math.exp %31 : vector<8x128xf32>
    %cst_19 = arith.constant dense<0.000000e+00> : vector<8xf32>
    %33 = vector.multi_reduction <add>, %32, %cst_19 [1] : vector<8x128xf32> to vector<8xf32>
    %34 = vector.shape_cast %33 : vector<8xf32> to vector<8x1xf32>
    %35 = math.log %34 : vector<8x1xf32>
    %36 = vector.broadcast %35 : vector<8x1xf32> to vector<8x128xf32>
    %37 = arith.subf %31, %36 : vector<8x128xf32>
    %c0_20 = arith.constant 0 : index
    %c0_21 = arith.constant 0 : index
    %38 = vector.load %arg8[%c0_20, %c0_21] : memref<8x128xf32, #tpu.memory_space<vmem>>, vector<8x128xf32>
    tpu.vector_store %arg8[%c0_20, %c0_21], %37 {strides = array<i32>} : memref<8x128xf32, #tpu.memory_space<vmem>>, vector<8x128xf32>,
    return
  }
  func.func @transform_0(%arg0: i32) -> (i32, i32) {
    %c0_i32 = arith.constant 0 : i32
    %c0_i32_0 = arith.constant 0 : i32
    return %arg0, %c0_i32 : i32, i32
  }
  func.func @transform_1(%arg0: i32) -> (i32, i32) {
    %c0_i32 = arith.constant 0 : i32
    %c0_i32_0 = arith.constant 0 : i32
    %c0_i32_1 = arith.constant 0 : i32
    return %c0_i32, %c0_i32_0 : i32, i32
  }
  func.func @transform_2(%arg0: i32) -> (i32, i32) {
    %c0_i32 = arith.constant 0 : i32
    %c0_i32_0 = arith.constant 0 : i32
    %c0_i32_1 = arith.constant 0 : i32
    return %c0_i32, %c0_i32_0 : i32, i32
  }
  func.func @transform_3(%arg0: i32) -> (i32, i32) {
    %c0_i32 = arith.constant 0 : i32
    %c0_i32_0 = arith.constant 0 : i32
    %c0_i32_1 = arith.constant 0 : i32
    return %c0_i32, %c0_i32_0 : i32, i32
  }
  func.func @transform_4(%arg0: i32) -> (i32, i32) {
    %c0_i32 = arith.constant 0 : i32
    %c0_i32_0 = arith.constant 0 : i32
    %c0_i32_1 = arith.constant 0 : i32
    return %c0_i32, %c0_i32_0 : i32, i32
  }
  func.func @transform_5(%arg0: i32) -> (i32, i32) {
    %c0_i32 = arith.constant 0 : i32
    %c0_i32_0 = arith.constant 0 : i32
    %c0_i32_1 = arith.constant 0 : i32
    return %c0_i32, %c0_i32_0 : i32, i32
  }
  func.func @transform_6(%arg0: i32) -> (i32, i32) {
    %c0_i32 = arith.constant 0 : i32
    %c0_i32_0 = arith.constant 0 : i32
    %c0_i32_1 = arith.constant 0 : i32
    return %c0_i32, %c0_i32_0 : i32, i32
  }
  func.func @transform_7(%arg0: i32) -> (i32, i32) {
    %c0_i32 = arith.constant 0 : i32
    %c0_i32_0 = arith.constant 0 : i32
    return %arg0, %c0_i32 : i32, i32
  }
}

</mosaic_0001>

<bundles_post_ra>
// kernel: classifier_forward.1
= control target key start
LH: loop header
LB: loop body
LE: loop exit
PB: predicated region body
PF: predicated region fallthrough
CT: control target
= control target key end

     0   :  { %12 = vsyncpa [#allocation3], 0  ;;  %s744_s0 = inlined_call_operand.hbm [shape: f32[8,32], index: 0, kind: input, shape index: {}]   ;;  %s745_s1 = inlined_call_operand.hbm [shape: bf16[32,128], index: 1, kind: input, shape index: {}]   ;;  %s746_s2 = inlined_call_operand.vmem [shape: f32[1,128], index: 2, kind: input, shape index: {}]   ;;  %s747_s3 = inlined_call_operand.hbm [shape: bf16[128,128], index: 3, kind: input, shape index: {}]   ;;  %s748_s4 = inlined_call_operand.vmem [shape: f32[1,128], index: 4, kind: input, shape index: {}]   ;;  %s749_s5 = inlined_call_operand.hbm [shape: bf16[128,128], index: 5, kind: input, shape index: {}]   ;;  %s750_s6 = inlined_call_operand.vmem [shape: f32[1,128], index: 6, kind: input, shape index: {}]   ;;  %s751_s7 = inlined_call_operand.hbm [shape: f32[8,128], index: 7, kind: output, shape index: {}]  }
   0x1   :  { %13 = vsyncpa [#allocation6], 0 }
   0x2   :  { %14 = vsyncpa [#allocation9], 0 }
   0x3   :  { %15 = vsyncpa [#allocation4], 0  ;;  %s638_s24 = smov [#allocation5]  }
   0x4   :  { %s31_s25 = sshll.u32 %s638_s24, 4  ;;  %s32_s25 = int_to_ptr.vmem [resolvable:$true] %s31_s25 }
   0x5   :  { %s538_s26 = scalar_lea.vmem %s32_s25, 256  ;;  %p543_p1 = scmp.lt.s32.totalorder %s32_s25, %s32_s25 }
   0x6   :  { %p539_p0 = scmp.ne.s32.totalorder %s32_s25, %s538_s26  ;;  %p544_p2 = scmp.lt.s32.totalorder %s538_s26, %s538_s26 }
   0x8   :  { %p545_p3 = por %p544_p2, %p543_p1 }
   0xa   :  { %p546_p4 = pnand %p545_p3, %p539_p0 }
   0xc   :  { %549 = shalt.err (!%p546_p4)
}
   0xd   :  { %s639_s27 = smov 64   ;;  %s640_s28 = smov 4  }
   0xe   :  { %37 = dma.hbm_to_vmem [thread:$0]  %s745_s1, 256, %s32_s25, [#allocation6], %s639_s27, %s639_s27, %s640_s28  }
   0xf   :  { %s641_s8 = smov [#allocation2]   ;;  %s642_s10 = smov [#allocation7]  }
  0x10   :  { %s22_s9 = sshll.u32 %s641_s8, 4  ;;  %s45_s11 = sshll.u32 %s642_s10, 4  ;;  %s23_s9 = int_to_ptr.vmem [resolvable:$true] %s22_s9  ;;  %s46_s11 = int_to_ptr.vmem [resolvable:$true] %s45_s11 }
  0x11   :  { %s558_s12 = scalar_lea.vmem %s23_s9, 128  ;;  %p563_p6 = scmp.lt.s32.totalorder %s23_s9, %s23_s9 }
  0x12   :  { %p559_p5 = scmp.ne.s32.totalorder %s23_s9, %s558_s12  ;;  %p564_p7 = scmp.lt.s32.totalorder %s558_s12, %s558_s12 }
  0x14   :  { %p565_p8 = por %p564_p7, %p563_p6 }
  0x16   :  { %p566_p9 = pnand %p565_p8, %p559_p5 }
  0x18   :  { %569 = shalt.err (!%p566_p9)
}
  0x19   :  { %25 = dma.hbm_to_vmem [thread:$0]  %s744_s0, 128, %s23_s9, [#allocation3]  }
  0x1a   :  { %s578_s15 = scalar_lea.vmem %s46_s11, 1024  ;;  %p583_p11 = scmp.lt.s32.totalorder %s46_s11, %s46_s11 }
  0x1b   :  { %p579_p10 = scmp.ne.s32.totalorder %s46_s11, %s578_s15  ;;  %p584_p12 = scmp.lt.s32.totalorder %s578_s15, %s578_s15 }
  0x1d   :  { %p585_p13 = por %p584_p12, %p583_p11 }
  0x1f   :  { %p586_p0 = pnand %p585_p13, %p579_p10 }
  0x21   :  { %589 = shalt.err (!%p586_p0)
}
  0x22   :  { %51 = dma.hbm_to_vmem [thread:$0]  %s747_s3, 1024, %s46_s11, [#allocation6], %s639_s27, %s639_s27, %s640_s28  }
  0x23   :  { %s643_s17 = smov [#allocation8]  }
  0x24   :  { %s59_s18 = sshll.u32 %s643_s17, 4  ;;  %s60_s18 = int_to_ptr.vmem [resolvable:$true] %s59_s18 }
  0x25   :  { %s598_s19 = scalar_lea.vmem %s60_s18, 1024  ;;  %p603_p2 = scmp.lt.s32.totalorder %s60_s18, %s60_s18 }
  0x26   :  { %p599_p1 = scmp.ne.s32.totalorder %s60_s18, %s598_s19  ;;  %p604_p3 = scmp.lt.s32.totalorder %s598_s19, %s598_s19 }
  0x28   :  { %p605_p4 = por %p604_p3, %p603_p2 }
  0x2a   :  { %p606_p5 = pnand %p605_p4, %p599_p1 }
  0x2c   :  { %609 = shalt.err (!%p606_p5)
}
  0x2d   :  { %65 = dma.hbm_to_vmem [thread:$0]  %s749_s5, 1024, %s60_s18, [#allocation9], %s639_s27, %s639_s27, %s640_s28  }
  0x2e   :  { %630 = dma.done.wait [#allocation3], 128  }
  0x2f   :  { %631 = vsyncadd [#allocation3], 4294967168 }
  0x30   :  { %632 = dma.done.wait [#allocation6], 1280  }
  0x31   :  { %633 = vsyncadd [#allocation6], 4294966016 }
  0x32   :  { %634 = dma.done.wait [#allocation9], 1024  }
  0x33   :  { %635 = vsyncadd [#allocation9], 4294966272  ;;  %v644_v0 = vmov 0.0   ;;  %vm645_vm0 = vmmov 0   ;;  %v508_v1 = vld [vmem:[#allocation5 + $0x8] sm:$0xff]   ;;  %v509_v2 = vld [vmem:[#allocation5] sm:$0xff]   ;;  %v376_v37 = vlaneseq }
  0x34   :  { %451 = vmatprep.subr.bf16.mxu0 %v644_v0  ;;  %455 = vmatprep.mubr.msk.bf16.mxu0 %vm645_vm0, %v644_v0  ;;  %v81_v3 = vld [vmem:[#allocation2] sm:$0xff]  ;;  %v510_v4 = vld [vmem:[#allocation7 + $0x38] sm:$0xff]   ;;  %v511_v6 = vld [vmem:[#allocation7 + $0x30] sm:$0xff]   ;;  %vm106_vm1 = vcmask 261120  }
  0x35   :  { %459 = vmatprep.subr.bf16.mxu1 %v644_v0  ;;  %475 = vmatprep.mubr.msk.bf16.mxu1 %vm645_vm0, %v644_v0  ;;  %v82_v5 = vpack.c.bf16 %v81_v3, %v81_v3  ;;  %v512_v7 = vld [vmem:[#allocation7 + $0x28] sm:$0xff]   ;;  %v513_v8 = vld [vmem:[#allocation7 + $0x20] sm:$0xff]   ;;  %v514_v9 = vld [vmem:[#allocation7 + $0x18] sm:$0xff]   ;;  %v377_v38 = vand.u32 127, %v376_v37 }
  0x36   :  { %452 = vmatpush3.bf16.msra.mxu0 %v508_v1  ;;  %460 = vmatpush3.bf16.msra.mxu1 %v510_v4  ;;  %v515_v10 = vld [vmem:[#allocation7 + $0x10] sm:$0xff]   ;;  %v516_v11 = vld [vmem:[#allocation7 + $0x8] sm:$0xff]   ;;  %v517_v12 = vld [vmem:[#allocation7] sm:$0xff]  }
  0x37   :  { %453 = vmatprep.subr.bf16.mxu0 %v644_v0  ;;  %461 = vmatprep.subr.bf16.mxu1 %v644_v0  ;;  %v518_v13 = vld [vmem:[#allocation8 + $0x38] sm:$0xff]   ;;  %v519_v14 = vld [vmem:[#allocation8 + $0x30] sm:$0xff]   ;;  %v520_v15 = vld [vmem:[#allocation8 + $0x28] sm:$0xff]   ;;  %vm378_vm2 = vcmp.lt.s32.totalorder %v377_v38, 10 }
  0x38   :  { %v521_v16 = vld [vmem:[#allocation8 + $0x20] sm:$0xff]   ;;  %v522_v17 = vld [vmem:[#allocation8 + $0x18] sm:$0xff]   ;;  %v523_v18 = vld [vmem:[#allocation8 + $0x10] sm:$0xff]  }
  0x39   :  { %v408_v19 = vld [vmem:[%s746_s2] ss:$0 sm:$0xff]  ;;  %v525_v28 = vld [vmem:[#allocation8] sm:$0xff]  }
  0x3a   :  { %454 = vmatpush3.bf16.msra.mxu0 %v509_v2  ;;  %462 = vmatpush3.bf16.msra.mxu1 %v511_v6  ;;  %v524_v27 = vld [vmem:[#allocation8 + $0x8] sm:$0xff]  }
  0x3b   :  { %479 = vmatprep.subr.bf16.mxu0 %v644_v0  ;;  %463 = vmatprep.subr.bf16.mxu1 %v644_v0  ;;  %v412_v29 = vld [vmem:[%s748_s4] ss:$0 sm:$0xff]  ;;  %s646_s4 = smov [#allocation10]  }
  0x3c   :  { %v421_v39 = vld [vmem:[%s750_s6] ss:$0 sm:$0xff]  ;;  %s397_s24 = sshll.u32 %s646_s4, 4  ;;  %s398_s24 = int_to_ptr.vmem [resolvable:$true] %s397_s24 }
  0x3d   :  { %456 = vmatmul.mubr.msk.bf16.vlgmr.msra.gmra.mxu0 %vm106_vm1, %v82_v5  ;;  %s610_s6 = scalar_lea.vmem %s398_s24, 128  ;;  %p615_p7 = scmp.lt.s32.totalorder %s398_s24, %s398_s24 }
  0x3e   :  { %495 = vmatprep.mubr.msk.bf16.mxu0 %vm645_vm0, %v644_v0  ;;  %464 = vmatpush3.bf16.msra.mxu1 %v512_v7  ;;  %p611_p6 = scmp.ne.s32.totalorder %s398_s24, %s610_s6  ;;  %p616_p8 = scmp.lt.s32.totalorder %s610_s6, %s610_s6 }
  0x3f   :  { %465 = vmatprep.subr.bf16.mxu1 %v644_v0  ;;  %480 = vmatpush3.bf16.msra.mxu0 %v518_v13 }
  0x40   :  { %481 = vmatprep.subr.bf16.mxu0 %v644_v0  ;;  %p617_p9 = por %p616_p8, %p615_p7 }
  0x42   :  { %466 = vmatpush3.bf16.msra.mxu1 %v513_v8  ;;  %p618_p10 = pnand %p617_p9, %p611_p6 }
  0x43   :  { %467 = vmatprep.subr.bf16.mxu1 %v644_v0  ;;  %482 = vmatpush3.bf16.msra.mxu0 %v519_v14 }
  0x44   :  { %483 = vmatprep.subr.bf16.mxu0 %v644_v0 }
  0x46   :  { %468 = vmatpush3.bf16.msra.mxu1 %v514_v9 }
  0x47   :  { %469 = vmatprep.subr.bf16.mxu1 %v644_v0  ;;  %484 = vmatpush3.bf16.msra.mxu0 %v520_v15 }
  0x48   :  { %485 = vmatprep.subr.bf16.mxu0 %v644_v0 }
  0x4a   :  { %470 = vmatpush3.bf16.msra.mxu1 %v515_v10 }
  0x4b   :  { %471 = vmatprep.subr.bf16.mxu1 %v644_v0  ;;  %486 = vmatpush3.bf16.msra.mxu0 %v521_v16 }
  0x4c   :  { %487 = vmatprep.subr.bf16.mxu0 %v644_v0 }
  0x4e   :  { %472 = vmatpush3.bf16.msra.mxu1 %v516_v11 }
  0x4f   :  { %473 = vmatprep.subr.bf16.mxu1 %v644_v0  ;;  %488 = vmatpush3.bf16.msra.mxu0 %v522_v17 }
  0x50   :  { %489 = vmatprep.subr.bf16.mxu0 %v644_v0 }
  0x52   :  { %474 = vmatpush3.bf16.msra.mxu1 %v517_v12 }
  0x53   :  { %490 = vmatpush3.bf16.msra.mxu0 %v523_v18 }
  0x54   :  { %491 = vmatprep.subr.bf16.mxu0 %v644_v0 }
  0x57   :  { %492 = vmatpush3.bf16.msra.mxu0 %v524_v27 }
  0x58   :  { %493 = vmatprep.subr.bf16.mxu0 %v644_v0 }
  0x5b   :  { %494 = vmatpush3.bf16.msra.mxu0 %v525_v28 }
  0xfd   :  { %v144_v20 = vpop.f32.mrf.mxu0 }
  0xfe   :  { %v145_v21 = vadd.f32 %v408_v19, %v144_v20 }
  0xff   :  { %v457_v22 = vpop.f32.mrf.mxu0 }
 0x100   :  { %v150_v23 = vmax.f32 %v145_v21, 0.0 }
 0x101   :  { %v147_v24 = vpop.f32.mrf.mxu0 }
 0x102   :  { %v151_v25 = vpack.c.bf16 %v150_v23, %v150_v23 }
 0x103   :  { %v458_v26 = vpop.f32.mrf.mxu0 }
 0x104   :  { %476 = vmatmul.mubr.bf16.vlgmr.msra.gmra.mxu1 %v151_v25 }
 0x1c4   :  { %v257_v30 = vpop.f32.mrf.mxu1 }
 0x1c5   :  { %v258_v31 = vadd.f32 %v412_v29, %v257_v30 }
 0x1c6   :  { %v477_v32 = vpop.f32.mrf.mxu1 }
 0x1c7   :  { %v263_v33 = vmax.f32 %v258_v31, 0.0 }
 0x1c8   :  { %v260_v34 = vpop.f32.mrf.mxu1 }
 0x1c9   :  { %v264_v35 = vpack.c.bf16 %v263_v33, %v263_v33 }
 0x1ca   :  { %v478_v36 = vpop.f32.mrf.mxu1 }
 0x1cb   :  { %496 = vmatmul.mubr.bf16.vlgmr.msra.gmra.mxu0 %v264_v35 }
 0x28b   :  { %v370_v40 = vpop.f32.mrf.mxu0 }
 0x28c   :  { %v371_v41 = vadd.f32 %v421_v39, %v370_v40 }
 0x28d   :  { %v497_v42 = vpop.f32.mrf.mxu0 }
 0x28e   :  { %v379_v43 = vsel %vm378_vm2, %v371_v41, -1e+30 }
 0x28f   :  { %380 = vmax.xlane.f32.xlu0 %v379_v43  ;;  %v373_v44 = vpop.f32.mrf.mxu0 }
 0x291   :  { %v498_v45 = vpop.f32.mrf.mxu0 }
 0x318   :  { %v381_v46 = vpop.xlane.xlu0 %380 }
 0x319   :  { %v382_v47 = vsub.f32 %v379_v43, %v381_v46 }
 0x31b   :  { %v383_v48 = vmul.f32 1.442695, %v382_v47 }
 0x31d   :  { %526 = vpow2.f32 %v383_v48 }
 0x32a   :  { %v527_v49 = vpop.eup %526 }
 0x32b   :  { %385 = vadd.xlane.f32.xlu0 %v527_v49 }
 0x3b4   :  { %v386_v50 = vpop.xlane.xlu0 %385 }
 0x3b5   :  { %528 = vlog2.f32 %v386_v50 }
 0x3c2   :  { %v529_v51 = vpop.eup %528 }
 0x3c3   :  { %v388_v52 = vmul.f32 0.6931472, %v529_v51 }
 0x3c5   :  { %v389_v53 = vsub.f32 %v382_v47, %v388_v52 }
 0x3c7   :  { %390 = vst [vmem:[#allocation10] sm:$0xff] %v389_v53 }
 0x3c8   :  { %621 = shalt.err (!%p618_p10)
}
 0x3c9   :  { %400 = dma.vmem_to_hbm [thread:$0]  %s398_s24, 128, %s751_s7, [#allocation4]  }
 0x3ca   :  { %636 = dma.done.wait [#allocation4], 128  }
 0x3cb   :  { %637 = vsyncadd [#allocation4], 4294967168 }
 0x3cc   :  { %404 = vsyncpa [#allocation3], 1 }
 0x3cd   :  { %405 = vsyncpa [#allocation6], 1 }
 0x3ce   :  { %406 = vsyncpa [#allocation9], 1 }
 0x3cf   :  { %407 = vsyncpa [#allocation4], 1 }

</bundles_post_ra>
